<compile_context>
chip_gen: v5e
topology: v5e:2x2
jax: 0.10.0
libtpu: 0.0.40
codegen_flags: <defaults>
</compile_context>

<pallas_src>
import functools
import math

import jax
import jax.numpy as jnp
from jax.experimental import pallas as pl
from jax.experimental.pallas import tpu as pltpu

_LANE = 128
_SUBLANE = 8
_MIN_SPLIT_ROWS = 512        # split a lone tile in two only if it has >= 512 rows
_BUFFERED_WEIGHTS_OK = True  # flipped to False if pipeline_mode=pl.Buffered(1) is rejected


def _round_up(v, m):
    return ((v + m - 1) // m) * m


# ----------------------------------------------------------------------------
# Fused kernel: whole MLP (all hidden layers + concatenated heads) for one
# batch tile.
#   refs = (x, w_0, b_0, ..., w_{n-1}, b_{n-1}, w_head, b_head, out)
#   x: (tm, K_in) f32, w_i: (K_i, N_i) f32|bf16, b_i: (1, N_i) f32,
#   out: (tm, N_head) f32 with N_head % 128 == 0 (lane-dense stores).
# ----------------------------------------------------------------------------
def _fused_mlp_kernel(*refs, n_hidden, act):
    x_ref = refs[0]
    o_ref = refs[-1]
    wb = refs[1:-1]

    h = x_ref[...]                                        # f32 activations
    for i in range(n_hidden + 1):
        w = wb[2 * i][...]
        b = wb[2 * i + 1][...]
        # MXU matmul: activations follow the weight dtype (f32 or bf16);
        # accumulation is always f32.
        z = jnp.dot(h.astype(w.dtype), w, preferred_element_type=jnp.float32)
        z = z + b                                         # f32 bias epilogue (VPU)
        if i < n_hidden:
            h = jnp.tanh(z) if act == "tanh" else jnp.maximum(z, 0.0)
        else:
            o_ref[...] = z.astype(o_ref.dtype)


def _const_block_spec(shape, buffered):
    """Full-array, grid-invariant block. With buffered=True, request a single
    VMEM buffer (default pipelining double-buffers constant blocks for no
    benefit; matters on v7x's 64 MiB VMEM with wider layers)."""
    if buffered:
        try:
            return pl.BlockSpec(shape, lambda i: (0, 0), pipeline_mode=pl.Buffered(1))
        except TypeError:
            pass
    return pl.BlockSpec(shape, lambda i: (0, 0))


# ----------------------------------------------------------------------------
# One jit for the whole forward path.
# ----------------------------------------------------------------------------
def _forward_impl(x, tensors, *, input_size, n_hidden, act, head_slices, tm, buffered):
    x = x.reshape(-1, input_size).astype(jnp.float32)
    M, K = x.shape
    n_out = tensors[-1].shape[-1]                 # padded head width (multiple of 128)

    # ---- Balanced batch tiling ---------------------------------------------
    n_tiles = max(1, pl.cdiv(M, tm))
    if n_tiles == 1 and M >= _MIN_SPLIT_ROWS:
        n_tiles = 2                               # feed both v7x TensorCores
    tm_eff = _round_up(pl.cdiv(M, n_tiles), _SUBLANE)
    M_pad = _round_up(M, tm_eff)
    if M_pad != M:
        # Pad stays inside the jit so XLA fuses it with the custom call.
        # TODO(synk): for very wide inputs, mask the ragged tail in-kernel
        # (scalar-prefetch M + masked pltpu.store) instead of materializing a pad.
        x = jnp.pad(x, ((0, M_pad - M), (0, 0)))
    grid = (M_pad // tm_eff,)

    # ---- BlockSpecs ----------------------------------------------------------
    in_specs = [pl.BlockSpec((tm_eff, K), lambda i: (i, 0))]     # batch-tiled input
    for t in tensors:
        in_specs.append(_const_block_spec(t.shape, buffered))    # resident weights
    out_spec = pl.BlockSpec((tm_eff, n_out), lambda i: (i, 0))   # lane-dense output

    # ---- VMEM budget (v7x: 64 MiB physical, 32 MiB default scoped) ----------
    weight_bytes = sum(int(t.size) * t.dtype.itemsize for t in tensors)
    widths = [K] + [int(tensors[2 * i].shape[1]) for i in range(n_hidden + 1)]
    vmem_need = (2 * tm_eff * K * 4                    # double-buffered input tile
                 + 2 * tm_eff * n_out * 4              # double-buffered output tile
                 + (1 if buffered else 2) * weight_bytes
                 + 2 * tm_eff * max(widths) * 4)       # live intermediate activations
    vmem_limit = int(min(max(2 * vmem_need, 16 << 20), 64 << 20))
    # TODO(synk): for hidden widths >~2k, switch that layer to a K/N-tiled
    # pltpu.emit_pipeline instead of the all-weights-resident design.

    # ---- Advisory cost estimate ----------------------------------------------
    flops = 0
    transc = 0
    for i in range(n_hidden + 1):
        w = tensors[2 * i]
        flops += 2 * M_pad * int(w.shape[0]) * int(w.shape[1])
        if i < n_hidden and act == "tanh":
            transc += M_pad * int(w.shape[1])
    bytes_accessed = int(x.size) * 4 + weight_bytes + M_pad * n_out * 4

    kernel = functools.partial(_fused_mlp_kernel, n_hidden=n_hidden, act=act)
    out = pl.pallas_call(
        kernel,
        out_shape=jax.ShapeDtypeStruct((M_pad, n_out), jnp.float32),
        grid_spec=pltpu.PrefetchScalarGridSpec(
            num_scalar_prefetch=0,
            grid=grid,
            in_specs=in_specs,
            out_specs=out_spec,
        ),
        compiler_params=pltpu.CompilerParams(
            dimension_semantics=("parallel",),
            vmem_limit_bytes=vmem_limit,
        ),
        cost_estimate=pl.CostEstimate(
            flops=flops, transcendentals=transc, bytes_accessed=bytes_accessed),
    )(x, *tensors)

    out = out[:M]
    return {name: out[:, off:off + size] for name, (off, size) in head_slices}


_forward_jit = jax.jit(
    _forward_impl,
    static_argnames=("input_size", "n_hidden", "act", "head_slices", "tm", "buffered"),
)


# ----------------------------------------------------------------------------
# Parameter init (mimics torch.nn.Linear defaults) + one-time fusion prep.
# ----------------------------------------------------------------------------
def init_linear_params(key, in_size, out_size):
    k_w, k_b = jax.random.split(key)
    bound = 1.0 / math.sqrt(in_size)
    w = jax.random.uniform(k_w, (out_size, in_size), jnp.float32, -bound, bound)
    b = jax.random.uniform(k_b, (out_size,), jnp.float32, -bound, bound)
    return w, b


def init_multi_head_mlp(key, input_size, hidden_sizes, output_sizes):
    params = {"hidden": [], "heads": {}}
    sizes_in = [input_size] + list(hidden_sizes[:-1])
    for in_s, out_s in zip(sizes_in, hidden_sizes):
        key, sub = jax.random.split(key)
        params["hidden"].append(init_linear_params(sub, in_s, out_s))
    head_in = hidden_sizes[-1] if len(hidden_sizes) > 0 else input_size
    for name in output_sizes:
        key, sub = jax.random.split(key)
        params["heads"][name] = init_linear_params(sub, head_in, output_sizes[name])
    return params


def prepare_fused_params(params, input_size, act_func):
    """One-time transform: transpose PyTorch (out,in) weights to (in,out),
    zero-pad output feature dims to multiples of 128 (lane-dense stores), and
    concatenate all heads into a single matmul. Zero padding is exact: padded
    columns get tanh(0)/relu(0)=0 and meet zero weight rows downstream.
    Also materializes a bf16 copy of the weight matrices (biases stay f32)
    for the optional bf16-MXU path."""
    tensors = []
    in_dim_padded = input_size
    for (w, b) in params["hidden"]:
        out_size = w.shape[0]
        out_pad = _round_up(out_size, _LANE)
        wt = jnp.zeros((in_dim_padded, out_pad), jnp.float32)
        wt = wt.at[: w.shape[1], :out_size].set(jnp.transpose(w))
        bp = jnp.zeros((1, out_pad), jnp.float32).at[0, :out_size].set(b)
        tensors += [wt, bp]
        in_dim_padded = out_pad

    head_slices = []
    ws, bs = [], []
    off = 0
    for name, (w, b) in params["heads"].items():
        head_slices.append((name, (off, int(w.shape[0]))))
        ws.append(jnp.transpose(w))                    # (head_in, out_i)
        bs.append(b)
        off += int(w.shape[0])
    total = off
    total_pad = _round_up(max(total, 1), _LANE)
    w_cat = jnp.concatenate(ws, axis=1)
    b_cat = jnp.concatenate(bs, axis=0)
    w_pad = jnp.zeros((in_dim_padded, total_pad), jnp.float32)
    w_pad = w_pad.at[: w_cat.shape[0], :total].set(w_cat)
    b_pad = jnp.zeros((1, total_pad), jnp.float32).at[0, :total].set(b_cat)
    tensors += [w_pad, b_pad]

    tensors = tuple(jax.device_put(t) for t in tensors)
    tensors_bf16 = tuple(
        t.astype(jnp.bfloat16) if i % 2 == 0 else t for i, t in enumerate(tensors))
    return {
        "tensors": tensors,
        "tensors_bf16": tensors_bf16,
        "n_hidden": len(params["hidden"]),
        "act": "tanh" if act_func == "tanh" else "relu",
        "head_slices": tuple(head_slices),
        "input_size": int(input_size),
    }


def multi_head_mlp_forward(fused, x, *, tm=512, use_bf16=False):
    """Matches MultiHeadMLP.forward. use_bf16=True feeds the MXU bf16 weights
    and activations (f32 accumulation / epilogue) - a v6e/v7x throughput knob
    that trades the strict 1e-5 reference accuracy."""
    global _BUFFERED_WEIGHTS_OK
    tensors = fused["tensors_bf16"] if use_bf16 else fused["tensors"]
    kwargs = dict(
        input_size=fused["input_size"],
        n_hidden=fused["n_hidden"],
        act=fused["act"],
        head_slices=fused["head_slices"],
        tm=tm,
    )
    if _BUFFERED_WEIGHTS_OK:
        try:
            return _forward_jit(x, tensors, buffered=True, **kwargs)
        except Exception:  # pipeline_mode / Buffered(1) unsupported -> default buffering
            _BUFFERED_WEIGHTS_OK = False
    return _forward_jit(x, tensors, buffered=False, **kwargs)


# ----------------------------------------------------------------------------
# Pure-JAX reference for correctness checks.
# ----------------------------------------------------------------------------
def reference_forward(params, x, input_size, act_func="tanh"):
    x = x.reshape(-1, input_size).astype(jnp.float32)
    out = x
    act_fn = jnp.tanh if act_func == "tanh" else (lambda z: jnp.maximum(z, 0.0))
    for (w, b) in params["hidden"]:
        out = act_fn(out @ w.T + b)
    return {name: out @ w.T + b for name, (w, b) in params["heads"].items()}


if __name__ == "__main__":
    key = jax.random.PRNGKey(0)

    # Case 1: tanh MLP, 2 hidden layers, small batch (single 8-row tile).
    input_size = 16
    hidden_sizes = [32, 32]
    output_sizes = {"mu": 16, "log_sigma": 16, "weights": 8}
    batch = 6

    key, k_params, k_x = jax.random.split(key, 3)
    params = init_multi_head_mlp(k_params, input_size, hidden_sizes, output_sizes)
    fused = prepare_fused_params(params, input_size, "tanh")
    x = jax.random.normal(k_x, (batch, input_size), jnp.float32)

    outs = jax.tree_util.tree_map(jax.block_until_ready,
                                  multi_head_mlp_forward(fused, x))
    refs = reference_forward(params, x, input_size, "tanh")
    for name in output_sizes:
        assert outs[name].shape == (batch, output_sizes[name]), (name, outs[name].shape)
        assert jnp.allclose(outs[name], refs[name], atol=1e-5, rtol=1e-5), name

    # Case 2: no hidden layers (heads act directly on the input), relu config.
    key, k_params2, k_x2 = jax.random.split(key, 3)
    params2 = init_multi_head_mlp(k_params2, input_size, [], {"a": 8, "b": 24})
    fused2 = prepare_fused_params(params2, input_size, "relu")
    x2 = jax.random.normal(k_x2, (4, input_size), jnp.float32)
    outs2 = jax.tree_util.tree_map(jax.block_until_ready,
                                   multi_head_mlp_forward(fused2, x2))
    refs2 = reference_forward(params2, x2, input_size, "relu")
    for name in ("a", "b"):
        assert jnp.allclose(outs2[name], refs2[name], atol=1e-5, rtol=1e-5), name

    # Case 3: batch=600 exercises balanced tiling (2 x 304-row tiles, not 1024 rows).
    key, k_x3 = jax.random.split(key)
    x3 = jax.random.normal(k_x3, (600, input_size), jnp.float32)
    outs3 = jax.tree_util.tree_map(jax.block_until_ready,
                                   multi_head_mlp_forward(fused, x3))
    refs3 = reference_forward(params, x3, input_size, "tanh")
    for name in output_sizes:
        assert jnp.allclose(outs3[name], refs3[name], atol=1e-5, rtol=1e-5), name

    # Case 4: optional bf16-MXU path (v6e/v7x throughput knob), relaxed tolerance.
    outs_bf16 = jax.tree_util.tree_map(
        jax.block_until_ready, multi_head_mlp_forward(fused, x3, use_bf16=True))
    for name in output_sizes:
        assert jnp.allclose(outs_bf16[name], refs3[name], atol=5e-2, rtol=5e-2), name

    print("KERNEL_OK")
</pallas_src>

<mosaic_0001>
module attributes {stable_mosaic.version = 11 : i64} {
  func.func @_fused_mlp_kernel(%arg0: i32, %arg1: memref<8x16xf32, #tpu.memory_space<vmem>>, %arg2: memref<16x128xf32, #tpu.memory_space<vmem>>, %arg3: memref<1x128xf32, #tpu.memory_space<vmem>>, %arg4: memref<128x128xf32, #tpu.memory_space<vmem>>, %arg5: memref<1x128xf32, #tpu.memory_space<vmem>>, %arg6: memref<128x128xf32, #tpu.memory_space<vmem>>, %arg7: memref<1x128xf32, #tpu.memory_space<vmem>>, %arg8: memref<8x128xf32, #tpu.memory_space<vmem>>) attributes {dimension_semantics = [#tpu.dimension_semantics<parallel>], iteration_bounds = array<i64: 1>, scalar_prefetch = 0 : i64, scratch_operands = 0 : i64, tpu.core_type = #tpu.core_type<tc>, window_params = [{transform_indices = @transform_0, window_bounds = array<i64: 8, 16>}, {pipeline_mode = #tpu.pipeline_mode<synchronous>, transform_indices = @transform_1, window_bounds = array<i64: 16, 128>}, {pipeline_mode = #tpu.pipeline_mode<synchronous>, transform_indices = @transform_2, window_bounds = array<i64: 1, 128>}, {pipeline_mode = #tpu.pipeline_mode<synchronous>, transform_indices = @transform_3, window_bounds = array<i64: 128, 128>}, {pipeline_mode = #tpu.pipeline_mode<synchronous>, transform_indices = @transform_4, window_bounds = array<i64: 1, 128>}, {pipeline_mode = #tpu.pipeline_mode<synchronous>, transform_indices = @transform_5, window_bounds = array<i64: 128, 128>}, {pipeline_mode = #tpu.pipeline_mode<synchronous>, transform_indices = @transform_6, window_bounds = array<i64: 1, 128>}, {transform_indices = @transform_7, window_bounds = array<i64: 8, 128>}]} {
    %c0 = arith.constant 0 : index
    %c0_0 = arith.constant 0 : index
    %0 = vector.load %arg1[%c0, %c0_0] : memref<8x16xf32, #tpu.memory_space<vmem>>, vector<8x16xf32>
    %c0_1 = arith.constant 0 : index
    %c0_2 = arith.constant 0 : index
    %1 = vector.load %arg2[%c0_1, %c0_2] : memref<16x128xf32, #tpu.memory_space<vmem>>, vector<16x128xf32>
    %c0_3 = arith.constant 0 : index
    %c0_4 = arith.constant 0 : index
    %2 = vector.load %arg3[%c0_3, %c0_4] : memref<1x128xf32, #tpu.memory_space<vmem>>, vector<1x128xf32>
    %cst = arith.constant dense<0.000000e+00> : vector<8x128xf32>
    %3 = tpu.matmul %0, %1, %cst {dimension_numbers = #tpu.dot_dimension_numbers<[1], [0], [0], [1], [0, 0, 1, 1], [], []>} : vector<8x16xf32>, vector<16x128xf32>, vector<8x128xf32> -> vector<8x128xf32>
    %4 = vector.broadcast %2 : vector<1x128xf32> to vector<8x128xf32>
    %5 = arith.addf %3, %4 : vector<8x128xf32>
    %6 = math.tanh %5 : vector<8x128xf32>
    %c0_5 = arith.constant 0 : index
    %c0_6 = arith.constant 0 : index
    %7 = vector.load %arg4[%c0_5, %c0_6] : memref<128x128xf32, #tpu.memory_space<vmem>>, vector<128x128xf32>
    %c0_7 = arith.constant 0 : index
    %c0_8 = arith.constant 0 : index
    %8 = vector.load %arg5[%c0_7, %c0_8] : memref<1x128xf32, #tpu.memory_space<vmem>>, vector<1x128xf32>
    %cst_9 = arith.constant dense<0.000000e+00> : vector<8x128xf32>
    %9 = tpu.matmul %6, %7, %cst_9 {dimension_numbers = #tpu.dot_dimension_numbers<[1], [0], [0], [1], [0, 0, 1, 1], [], []>} : vector<8x128xf32>, vector<128x128xf32>, vector<8x128xf32> -> vector<8x128xf32>
    %10 = vector.broadcast %8 : vector<1x128xf32> to vector<8x128xf32>
    %11 = arith.addf %9, %10 : vector<8x128xf32>
    %12 = math.tanh %11 : vector<8x128xf32>
    %c0_10 = arith.constant 0 : index
    %c0_11 = arith.constant 0 : index
    %13 = vector.load %arg6[%c0_10, %c0_11] : memref<128x128xf32, #tpu.memory_space<vmem>>, vector<128x128xf32>
    %c0_12 = arith.constant 0 : index
    %c0_13 = arith.constant 0 : index
    %14 = vector.load %arg7[%c0_12, %c0_13] : memref<1x128xf32, #tpu.memory_space<vmem>>, vector<1x128xf32>
    %cst_14 = arith.constant dense<0.000000e+00> : vector<8x128xf32>
    %15 = tpu.matmul %12, %13, %cst_14 {dimension_numbers = #tpu.dot_dimension_numbers<[1], [0], [0], [1], [0, 0, 1, 1], [], []>} : vector<8x128xf32>, vector<128x128xf32>, vector<8x128xf32> -> vector<8x128xf32>
    %16 = vector.broadcast %14 : vector<1x128xf32> to vector<8x128xf32>
    %17 = arith.addf %15, %16 : vector<8x128xf32>
    %c0_15 = arith.constant 0 : index
    %c0_16 = arith.constant 0 : index
    %18 = vector.load %arg8[%c0_15, %c0_16] : memref<8x128xf32, #tpu.memory_space<vmem>>, vector<8x128xf32>
    tpu.vector_store %arg8[%c0_15, %c0_16], %17 {strides = array<i32>} : memref<8x128xf32, #tpu.memory_space<vmem>>, vector<8x128xf32>,
    return
  }
  func.func @transform_0(%arg0: i32) -> (i32, i32) {
    %c0_i32 = arith.constant 0 : i32
    %c0_i32_0 = arith.constant 0 : i32
    return %arg0, %c0_i32 : i32, i32
  }
  func.func @transform_1(%arg0: i32) -> (i32, i32) {
    %c0_i32 = arith.constant 0 : i32
    %c0_i32_0 = arith.constant 0 : i32
    %c0_i32_1 = arith.constant 0 : i32
    return %c0_i32, %c0_i32_0 : i32, i32
  }
  func.func @transform_2(%arg0: i32) -> (i32, i32) {
    %c0_i32 = arith.constant 0 : i32
    %c0_i32_0 = arith.constant 0 : i32
    %c0_i32_1 = arith.constant 0 : i32
    return %c0_i32, %c0_i32_0 : i32, i32
  }
  func.func @transform_3(%arg0: i32) -> (i32, i32) {
    %c0_i32 = arith.constant 0 : i32
    %c0_i32_0 = arith.constant 0 : i32
    %c0_i32_1 = arith.constant 0 : i32
    return %c0_i32, %c0_i32_0 : i32, i32
  }
  func.func @transform_4(%arg0: i32) -> (i32, i32) {
    %c0_i32 = arith.constant 0 : i32
    %c0_i32_0 = arith.constant 0 : i32
    %c0_i32_1 = arith.constant 0 : i32
    return %c0_i32, %c0_i32_0 : i32, i32
  }
  func.func @transform_5(%arg0: i32) -> (i32, i32) {
    %c0_i32 = arith.constant 0 : i32
    %c0_i32_0 = arith.constant 0 : i32
    %c0_i32_1 = arith.constant 0 : i32
    return %c0_i32, %c0_i32_0 : i32, i32
  }
  func.func @transform_6(%arg0: i32) -> (i32, i32) {
    %c0_i32 = arith.constant 0 : i32
    %c0_i32_0 = arith.constant 0 : i32
    %c0_i32_1 = arith.constant 0 : i32
    return %c0_i32, %c0_i32_0 : i32, i32
  }
  func.func @transform_7(%arg0: i32) -> (i32, i32) {
    %c0_i32 = arith.constant 0 : i32
    %c0_i32_0 = arith.constant 0 : i32
    return %arg0, %c0_i32 : i32, i32
  }
}

module attributes {stable_mosaic.version = 11 : i64} {
  func.func @_fused_mlp_kernel(%arg0: i32, %arg1: memref<8x16xf32, #tpu.memory_space<vmem>>, %arg2: memref<16x128xf32, #tpu.memory_space<vmem>>, %arg3: memref<1x128xf32, #tpu.memory_space<vmem>>, %arg4: memref<128x128xf32, #tpu.memory_space<vmem>>, %arg5: memref<1x128xf32, #tpu.memory_space<vmem>>, %arg6: memref<128x128xf32, #tpu.memory_space<vmem>>, %arg7: memref<1x128xf32, #tpu.memory_space<vmem>>, %arg8: memref<8x128xf32, #tpu.memory_space<vmem>>) attributes {dimension_semantics = [#tpu.dimension_semantics<parallel>], iteration_bounds = array<i64: 1>, scalar_prefetch = 0 : i64, scratch_operands = 0 : i64, tpu.core_type = #tpu.core_type<tc>, window_params = [{transform_indices = @transform_0, window_bounds = array<i64: 8, 16>}, {pipeline_mode = #tpu.pipeline_mode<synchronous>, transform_indices = @transform_1, window_bounds = array<i64: 16, 128>}, {pipeline_mode = #tpu.pipeline_mode<synchronous>, transform_indices = @transform_2, window_bounds = array<i64: 1, 128>}, {pipeline_mode = #tpu.pipeline_mode<synchronous>, transform_indices = @transform_3, window_bounds = array<i64: 128, 128>}, {pipeline_mode = #tpu.pipeline_mode<synchronous>, transform_indices = @transform_4, window_bounds = array<i64: 1, 128>}, {pipeline_mode = #tpu.pipeline_mode<synchronous>, transform_indices = @transform_5, window_bounds = array<i64: 128, 128>}, {pipeline_mode = #tpu.pipeline_mode<synchronous>, transform_indices = @transform_6, window_bounds = array<i64: 1, 128>}, {transform_indices = @transform_7, window_bounds = array<i64: 8, 128>}]} {
    %c0 = arith.constant 0 : index
    %c0_0 = arith.constant 0 : index
    %0 = vector.load %arg1[%c0, %c0_0] : memref<8x16xf32, #tpu.memory_space<vmem>>, vector<8x16xf32>
    %c0_1 = arith.constant 0 : index
    %c0_2 = arith.constant 0 : index
    %1 = vector.load %arg2[%c0_1, %c0_2] : memref<16x128xf32, #tpu.memory_space<vmem>>, vector<16x128xf32>
    %c0_3 = arith.constant 0 : index
    %c0_4 = arith.constant 0 : index
    %2 = vector.load %arg3[%c0_3, %c0_4] : memref<1x128xf32, #tpu.memory_space<vmem>>, vector<1x128xf32>
    %cst = arith.constant dense<0.000000e+00> : vector<8x128xf32>
    %3 = tpu.matmul %0, %1, %cst {dimension_numbers = #tpu.dot_dimension_numbers<[1], [0], [0], [1], [0, 0, 1, 1], [], []>} : vector<8x16xf32>, vector<16x128xf32>, vector<8x128xf32> -> vector<8x128xf32>
    %4 = vector.broadcast %2 : vector<1x128xf32> to vector<8x128xf32>
    %5 = arith.addf %3, %4 : vector<8x128xf32>
    %6 = math.tanh %5 : vector<8x128xf32>
    %c0_5 = arith.constant 0 : index
    %c0_6 = arith.constant 0 : index
    %7 = vector.load %arg4[%c0_5, %c0_6] : memref<128x128xf32, #tpu.memory_space<vmem>>, vector<128x128xf32>
    %c0_7 = arith.constant 0 : index
    %c0_8 = arith.constant 0 : index
    %8 = vector.load %arg5[%c0_7, %c0_8] : memref<1x128xf32, #tpu.memory_space<vmem>>, vector<1x128xf32>
    %cst_9 = arith.constant dense<0.000000e+00> : vector<8x128xf32>
    %9 = tpu.matmul %6, %7, %cst_9 {dimension_numbers = #tpu.dot_dimension_numbers<[1], [0], [0], [1], [0, 0, 1, 1], [], []>} : vector<8x128xf32>, vector<128x128xf32>, vector<8x128xf32> -> vector<8x128xf32>
    %10 = vector.broadcast %8 : vector<1x128xf32> to vector<8x128xf32>
    %11 = arith.addf %9, %10 : vector<8x128xf32>
    %12 = math.tanh %11 : vector<8x128xf32>
    %c0_10 = arith.constant 0 : index
    %c0_11 = arith.constant 0 : index
    %13 = vector.load %arg6[%c0_10, %c0_11] : memref<128x128xf32, #tpu.memory_space<vmem>>, vector<128x128xf32>
    %c0_12 = arith.constant 0 : index
    %c0_13 = arith.constant 0 : index
    %14 = vector.load %arg7[%c0_12, %c0_13] : memref<1x128xf32, #tpu.memory_space<vmem>>, vector<1x128xf32>
    %cst_14 = arith.constant dense<0.000000e+00> : vector<8x128xf32>
    %15 = tpu.matmul %12, %13, %cst_14 {dimension_numbers = #tpu.dot_dimension_numbers<[1], [0], [0], [1], [0, 0, 1, 1], [], []>} : vector<8x128xf32>, vector<128x128xf32>, vector<8x128xf32> -> vector<8x128xf32>
    %16 = vector.broadcast %14 : vector<1x128xf32> to vector<8x128xf32>
    %17 = arith.addf %15, %16 : vector<8x128xf32>
    %c0_15 = arith.constant 0 : index
    %c0_16 = arith.constant 0 : index
    %18 = vector.load %arg8[%c0_15, %c0_16] : memref<8x128xf32, #tpu.memory_space<vmem>>, vector<8x128xf32>
    tpu.vector_store %arg8[%c0_15, %c0_16], %17 {strides = array<i32>} : memref<8x128xf32, #tpu.memory_space<vmem>>, vector<8x128xf32>,
    return
  }
  func.func @transform_0(%arg0: i32) -> (i32, i32) {
    %c0_i32 = arith.constant 0 : i32
    %c0_i32_0 = arith.constant 0 : i32
    return %arg0, %c0_i32 : i32, i32
  }
  func.func @transform_1(%arg0: i32) -> (i32, i32) {
    %c0_i32 = arith.constant 0 : i32
    %c0_i32_0 = arith.constant 0 : i32
    %c0_i32_1 = arith.constant 0 : i32
    return %c0_i32, %c0_i32_0 : i32, i32
  }
  func.func @transform_2(%arg0: i32) -> (i32, i32) {
    %c0_i32 = arith.constant 0 : i32
    %c0_i32_0 = arith.constant 0 : i32
    %c0_i32_1 = arith.constant 0 : i32
    return %c0_i32, %c0_i32_0 : i32, i32
  }
  func.func @transform_3(%arg0: i32) -> (i32, i32) {
    %c0_i32 = arith.constant 0 : i32
    %c0_i32_0 = arith.constant 0 : i32
    %c0_i32_1 = arith.constant 0 : i32
    return %c0_i32, %c0_i32_0 : i32, i32
  }
  func.func @transform_4(%arg0: i32) -> (i32, i32) {
    %c0_i32 = arith.constant 0 : i32
    %c0_i32_0 = arith.constant 0 : i32
    %c0_i32_1 = arith.constant 0 : i32
    return %c0_i32, %c0_i32_0 : i32, i32
  }
  func.func @transform_5(%arg0: i32) -> (i32, i32) {
    %c0_i32 = arith.constant 0 : i32
    %c0_i32_0 = arith.constant 0 : i32
    %c0_i32_1 = arith.constant 0 : i32
    return %c0_i32, %c0_i32_0 : i32, i32
  }
  func.func @transform_6(%arg0: i32) -> (i32, i32) {
    %c0_i32 = arith.constant 0 : i32
    %c0_i32_0 = arith.constant 0 : i32
    %c0_i32_1 = arith.constant 0 : i32
    return %c0_i32, %c0_i32_0 : i32, i32
  }
  func.func @transform_7(%arg0: i32) -> (i32, i32) {
    %c0_i32 = arith.constant 0 : i32
    %c0_i32_0 = arith.constant 0 : i32
    return %arg0, %c0_i32 : i32, i32
  }
}

</mosaic_0001>

<bundles_post_ra>
// kernel: _forward_impl.1
= control target key start
LH: loop header
LB: loop body
LE: loop exit
PB: predicated region body
PF: predicated region fallthrough
CT: control target
= control target key end

     0   :  { %12 = vsyncpa [#allocation3], 0  ;;  %s313_s0 = inlined_call_operand.vmem [shape: f32[8,16], index: 0, kind: input, shape index: {}]   ;;  %s314_s1 = inlined_call_operand.vmem [shape: f32[16,128], index: 1, kind: input, shape index: {}]   ;;  %s315_s2 = inlined_call_operand.vmem [shape: f32[1,128], index: 2, kind: input, shape index: {}]   ;;  %s316_s3 = inlined_call_operand.hbm [shape: f32[128,128], index: 3, kind: input, shape index: {}]   ;;  %s317_s4 = inlined_call_operand.vmem [shape: f32[1,128], index: 4, kind: input, shape index: {}]   ;;  %s318_s5 = inlined_call_operand.hbm [shape: f32[128,128], index: 5, kind: input, shape index: {}]   ;;  %s319_s6 = inlined_call_operand.vmem [shape: f32[1,128], index: 6, kind: input, shape index: {}]   ;;  %s320_s7 = inlined_call_operand.vmem [shape: f32[8,128], index: 7, kind: output, shape index: {}]  }
   0x1   :  { %s24_s26 = sshll.u32 %s316_s3, 4  ;;  %s25_s26 = int_to_ptr.hbm [resolvable:$true] %s24_s26 }
   0x2   :  { %13 = vsyncpa [#allocation5], 0  ;;  %s242_s27 = smov [#allocation2]   ;;  %s39_s8 = sshll.u32 %s318_s5, 4  ;;  %s40_s8 = int_to_ptr.hbm [resolvable:$true] %s39_s8 }
   0x3   :  { %s26_s28 = sshll.u32 %s242_s27, 4  ;;  %s243_s9 = smov 128   ;;  %s27_s28 = int_to_ptr.vmem [resolvable:$true] %s26_s28 }
   0x4   :  { %s244_s10 = smov 8   ;;  %s245_s11 = smov [#allocation4]  }
   0x5   :  { %32 = dma.hbm_to_vmem [thread:$0]  %s25_s26, 2048, %s27_s28, [#allocation3], %s243_s9, %s243_s9, %s244_s10  }
   0x6   :  { %s41_s12 = sshll.u32 %s245_s11, 4  ;;  %s42_s12 = int_to_ptr.vmem [resolvable:$true] %s41_s12 }
   0x7   :  { %47 = dma.hbm_to_vmem [thread:$0]  %s40_s8, 2048, %s42_s12, [#allocation5], %s243_s9, %s243_s9, %s244_s10  }
   0x8   :  { %238 = dma.done.wait [#allocation3], 2048  }
   0x9   :  { %239 = vsyncadd [#allocation3], 4294965248 }
   0xa   :  { %240 = dma.done.wait [#allocation5], 2048  }
   0xb   :  { %241 = vsyncadd [#allocation5], 4294965248  ;;  %v60_v0 = vld [vmem:[%s314_s1 + $0x8] sm:$0xff]  ;;  %v59_v1 = vld [vmem:[%s314_s1] sm:$0xff]  ;;  %vm65_vm0 = vcmask 130048  }
   0xc   :  { %83 = vmatpush.msra.mxu0 %v60_v0  ;;  %v58_v2 = vld [vmem:[%s313_s0] sm:$0xff]  ;;  %v105_v3 = vld [vmem:[#allocation2 + $0x78] sm:$0xff]  ;;  %v104_v4 = vld [vmem:[#allocation2 + $0x70] sm:$0xff] }
   0xd   :  { %110 = vmatpush.msra.mxu1 %v105_v3  ;;  %v103_v5 = vld [vmem:[#allocation2 + $0x68] sm:$0xff]  ;;  %v102_v6 = vld [vmem:[#allocation2 + $0x60] sm:$0xff]  ;;  %v101_v7 = vld [vmem:[#allocation2 + $0x58] sm:$0xff] }
   0xe   :  { %84 = vmatpush.msra.mxu0 %v59_v1  ;;  %v100_v8 = vld [vmem:[#allocation2 + $0x50] sm:$0xff]  ;;  %v99_v9 = vld [vmem:[#allocation2 + $0x48] sm:$0xff]  ;;  %v98_v10 = vld [vmem:[#allocation2 + $0x40] sm:$0xff] }
   0xf   :  { %178 = vmatmul.msk.f32.vlgmr.msra.gmra.mxu0 %vm65_vm0, %v58_v2  ;;  %111 = vmatpush.msra.mxu1 %v104_v4  ;;  %v97_v11 = vld [vmem:[#allocation2 + $0x38] sm:$0xff]  ;;  %v96_v12 = vld [vmem:[#allocation2 + $0x30] sm:$0xff]  ;;  %v95_v13 = vld [vmem:[#allocation2 + $0x28] sm:$0xff] }
  0x10   :  { %v94_v14 = vld [vmem:[#allocation2 + $0x20] sm:$0xff]  ;;  %v93_v15 = vld [vmem:[#allocation2 + $0x18] sm:$0xff]  ;;  %v92_v16 = vld [vmem:[#allocation2 + $0x10] sm:$0xff] }
  0x11   :  { %112 = vmatpush.msra.mxu1 %v103_v5  ;;  %v91_v17 = vld [vmem:[#allocation2 + $0x8] sm:$0xff]  ;;  %v90_v18 = vld [vmem:[#allocation2] sm:$0xff]  ;;  %v146_v19 = vld [vmem:[#allocation4 + $0x78] sm:$0xff] }
  0x12   :  { %v145_v20 = vld [vmem:[#allocation4 + $0x70] sm:$0xff]  ;;  %151 = vmatpush.msra.mxu2 %v146_v19  ;;  %v144_v21 = vld [vmem:[#allocation4 + $0x68] sm:$0xff]  ;;  %v143_v22 = vld [vmem:[#allocation4 + $0x60] sm:$0xff] }
  0x13   :  { %113 = vmatpush.msra.mxu1 %v102_v6  ;;  %v142_v23 = vld [vmem:[#allocation4 + $0x58] sm:$0xff]  ;;  %v141_v24 = vld [vmem:[#allocation4 + $0x50] sm:$0xff]  ;;  %v140_v25 = vld [vmem:[#allocation4 + $0x48] sm:$0xff] }
  0x14   :  { %152 = vmatpush.msra.mxu2 %v145_v20  ;;  %v139_v26 = vld [vmem:[#allocation4 + $0x40] sm:$0xff]  ;;  %v138_v27 = vld [vmem:[#allocation4 + $0x38] sm:$0xff]  ;;  %v137_v28 = vld [vmem:[#allocation4 + $0x30] sm:$0xff] }
  0x15   :  { %114 = vmatpush.msra.mxu1 %v101_v7  ;;  %v136_v29 = vld [vmem:[#allocation4 + $0x28] sm:$0xff]  ;;  %v183_v30 = vld [vmem:[%s315_s2] ss:$0 sm:$0xff]  ;;  %v134_v35 = vld [vmem:[#allocation4 + $0x18] sm:$0xff] }
  0x16   :  { %153 = vmatpush.msra.mxu2 %v144_v21  ;;  %v135_v34 = vld [vmem:[#allocation4 + $0x20] sm:$0xff]  ;;  %v133_v36 = vld [vmem:[#allocation4 + $0x10] sm:$0xff]  ;;  %v132_v37 = vld [vmem:[#allocation4 + $0x8] sm:$0xff] }
  0x17   :  { %115 = vmatpush.msra.mxu1 %v100_v8  ;;  %v131_v38 = vld [vmem:[#allocation4] sm:$0xff] }
  0x18   :  { %154 = vmatpush.msra.mxu2 %v143_v22  ;;  %v184_v39 = vld [vmem:[%s317_s4] ss:$0 sm:$0xff] }
  0x19   :  { %116 = vmatpush.msra.mxu1 %v99_v9  ;;  %v185_v43 = vld [vmem:[%s319_s6] ss:$0 sm:$0xff] }
  0x1a   :  { %155 = vmatpush.msra.mxu2 %v142_v23 }
  0x1b   :  { %117 = vmatpush.msra.mxu1 %v98_v10 }
  0x1c   :  { %156 = vmatpush.msra.mxu2 %v141_v24 }
  0x1d   :  { %118 = vmatpush.msra.mxu1 %v97_v11 }
  0x1e   :  { %157 = vmatpush.msra.mxu2 %v140_v25 }
  0x1f   :  { %119 = vmatpush.msra.mxu1 %v96_v12 }
  0x20   :  { %158 = vmatpush.msra.mxu2 %v139_v26 }
  0x21   :  { %120 = vmatpush.msra.mxu1 %v95_v13 }
  0x22   :  { %159 = vmatpush.msra.mxu2 %v138_v27 }
  0x23   :  { %121 = vmatpush.msra.mxu1 %v94_v14 }
  0x24   :  { %160 = vmatpush.msra.mxu2 %v137_v28 }
  0x25   :  { %122 = vmatpush.msra.mxu1 %v93_v15 }
  0x26   :  { %161 = vmatpush.msra.mxu2 %v136_v29 }
  0x27   :  { %123 = vmatpush.msra.mxu1 %v92_v16 }
  0x28   :  { %162 = vmatpush.msra.mxu2 %v135_v34 }
  0x29   :  { %124 = vmatpush.msra.mxu1 %v91_v17 }
  0x2a   :  { %163 = vmatpush.msra.mxu2 %v134_v35 }
  0x2b   :  { %125 = vmatpush.msra.mxu1 %v90_v18 }
  0x2c   :  { %164 = vmatpush.msra.mxu2 %v133_v36 }
  0x2e   :  { %165 = vmatpush.msra.mxu2 %v132_v37 }
  0x30   :  { %166 = vmatpush.msra.mxu2 %v131_v38 }
  0x8c   :  { %v86_v31 = vpop.f32.mrf.mxu0 }
  0x8d   :  { %v87_v32 = vadd.f32 %v183_v30, %v86_v31 }
  0x8f   :  { %186 = vtanh.f32 %v87_v32 }
  0x95   :  { %v187_v33 = vpop.eup %186 }
  0x96   :  { %126 = vmatmul.f32.vlgmr.msra.gmra.mxu1 %v187_v33 }
 0x113   :  { %v127_v40 = vpop.f32.mrf.mxu1 }
 0x114   :  { %v128_v41 = vadd.f32 %v184_v39, %v127_v40 }
 0x116   :  { %188 = vtanh.f32 %v128_v41 }
 0x11c   :  { %v189_v42 = vpop.eup %188 }
 0x11d   :  { %167 = vmatmul.f32.vlgmr.msra.gmra.mxu2 %v189_v42 }
 0x1a0   :  { %v168_v44 = vpop.f32.mrf.mxu2 }
 0x1a1   :  { %v169_v45 = vadd.f32 %v185_v43, %v168_v44 }
 0x1a3   :  { %171 = vst [vmem:[%s320_s7] sm:$0xff] %v169_v45 }
 0x1a4   :  { %176 = vsyncpa [#allocation3], 1 }
 0x1a5   :  { %177 = vsyncpa [#allocation5], 1 }

// kernel: _forward_impl.1
= control target key start
LH: loop header
LB: loop body
LE: loop exit
PB: predicated region body
PF: predicated region fallthrough
CT: control target
= control target key end

     0   :  { %12 = vsyncpa [#allocation3], 0  ;;  %s313_s0 = inlined_call_operand.vmem [shape: f32[8,16], index: 0, kind: input, shape index: {}]   ;;  %s314_s1 = inlined_call_operand.vmem [shape: f32[16,128], index: 1, kind: input, shape index: {}]   ;;  %s315_s2 = inlined_call_operand.vmem [shape: f32[1,128], index: 2, kind: input, shape index: {}]   ;;  %s316_s3 = inlined_call_operand.hbm [shape: f32[128,128], index: 3, kind: input, shape index: {}]   ;;  %s317_s4 = inlined_call_operand.vmem [shape: f32[1,128], index: 4, kind: input, shape index: {}]   ;;  %s318_s5 = inlined_call_operand.hbm [shape: f32[128,128], index: 5, kind: input, shape index: {}]   ;;  %s319_s6 = inlined_call_operand.vmem [shape: f32[1,128], index: 6, kind: input, shape index: {}]   ;;  %s320_s7 = inlined_call_operand.vmem [shape: f32[8,128], index: 7, kind: output, shape index: {}]  }
   0x1   :  { %s24_s26 = sshll.u32 %s316_s3, 4  ;;  %s25_s26 = int_to_ptr.hbm [resolvable:$true] %s24_s26 }
   0x2   :  { %13 = vsyncpa [#allocation5], 0  ;;  %s242_s27 = smov [#allocation2]   ;;  %s39_s8 = sshll.u32 %s318_s5, 4  ;;  %s40_s8 = int_to_ptr.hbm [resolvable:$true] %s39_s8 }
   0x3   :  { %s26_s28 = sshll.u32 %s242_s27, 4  ;;  %s243_s9 = smov 128   ;;  %s27_s28 = int_to_ptr.vmem [resolvable:$true] %s26_s28 }
   0x4   :  { %s244_s10 = smov 8   ;;  %s245_s11 = smov [#allocation4]  }
   0x5   :  { %32 = dma.hbm_to_vmem [thread:$0]  %s25_s26, 2048, %s27_s28, [#allocation3], %s243_s9, %s243_s9, %s244_s10  }
   0x6   :  { %s41_s12 = sshll.u32 %s245_s11, 4  ;;  %s42_s12 = int_to_ptr.vmem [resolvable:$true] %s41_s12 }
   0x7   :  { %47 = dma.hbm_to_vmem [thread:$0]  %s40_s8, 2048, %s42_s12, [#allocation5], %s243_s9, %s243_s9, %s244_s10  }
   0x8   :  { %238 = dma.done.wait [#allocation3], 2048  }
   0x9   :  { %239 = vsyncadd [#allocation3], 4294965248 }
   0xa   :  { %240 = dma.done.wait [#allocation5], 2048  }
   0xb   :  { %241 = vsyncadd [#allocation5], 4294965248  ;;  %v60_v0 = vld [vmem:[%s314_s1 + $0x8] sm:$0xff]  ;;  %v59_v1 = vld [vmem:[%s314_s1] sm:$0xff]  ;;  %vm65_vm0 = vcmask 130048  }
   0xc   :  { %83 = vmatpush.msra.mxu0 %v60_v0  ;;  %v58_v2 = vld [vmem:[%s313_s0] sm:$0xff]  ;;  %v105_v3 = vld [vmem:[#allocation2 + $0x78] sm:$0xff]  ;;  %v104_v4 = vld [vmem:[#allocation2 + $0x70] sm:$0xff] }
   0xd   :  { %110 = vmatpush.msra.mxu1 %v105_v3  ;;  %v103_v5 = vld [vmem:[#allocation2 + $0x68] sm:$0xff]  ;;  %v102_v6 = vld [vmem:[#allocation2 + $0x60] sm:$0xff]  ;;  %v101_v7 = vld [vmem:[#allocation2 + $0x58] sm:$0xff] }
   0xe   :  { %84 = vmatpush.msra.mxu0 %v59_v1  ;;  %v100_v8 = vld [vmem:[#allocation2 + $0x50] sm:$0xff]  ;;  %v99_v9 = vld [vmem:[#allocation2 + $0x48] sm:$0xff]  ;;  %v98_v10 = vld [vmem:[#allocation2 + $0x40] sm:$0xff] }
   0xf   :  { %178 = vmatmul.msk.f32.vlgmr.msra.gmra.mxu0 %vm65_vm0, %v58_v2  ;;  %111 = vmatpush.msra.mxu1 %v104_v4  ;;  %v97_v11 = vld [vmem:[#allocation2 + $0x38] sm:$0xff]  ;;  %v96_v12 = vld [vmem:[#allocation2 + $0x30] sm:$0xff]  ;;  %v95_v13 = vld [vmem:[#allocation2 + $0x28] sm:$0xff] }
  0x10   :  { %v94_v14 = vld [vmem:[#allocation2 + $0x20] sm:$0xff]  ;;  %v93_v15 = vld [vmem:[#allocation2 + $0x18] sm:$0xff]  ;;  %v92_v16 = vld [vmem:[#allocation2 + $0x10] sm:$0xff] }
  0x11   :  { %112 = vmatpush.msra.mxu1 %v103_v5  ;;  %v91_v17 = vld [vmem:[#allocation2 + $0x8] sm:$0xff]  ;;  %v90_v18 = vld [vmem:[#allocation2] sm:$0xff]  ;;  %v146_v19 = vld [vmem:[#allocation4 + $0x78] sm:$0xff] }
  0x12   :  { %v145_v20 = vld [vmem:[#allocation4 + $0x70] sm:$0xff]  ;;  %151 = vmatpush.msra.mxu2 %v146_v19  ;;  %v144_v21 = vld [vmem:[#allocation4 + $0x68] sm:$0xff]  ;;  %v143_v22 = vld [vmem:[#allocation4 + $0x60] sm:$0xff] }
  0x13   :  { %113 = vmatpush.msra.mxu1 %v102_v6  ;;  %v142_v23 = vld [vmem:[#allocation4 + $0x58] sm:$0xff]  ;;  %v141_v24 = vld [vmem:[#allocation4 + $0x50] sm:$0xff]  ;;  %v140_v25 = vld [vmem:[#allocation4 + $0x48] sm:$0xff] }
  0x14   :  { %152 = vmatpush.msra.mxu2 %v145_v20  ;;  %v139_v26 = vld [vmem:[#allocation4 + $0x40] sm:$0xff]  ;;  %v138_v27 = vld [vmem:[#allocation4 + $0x38] sm:$0xff]  ;;  %v137_v28 = vld [vmem:[#allocation4 + $0x30] sm:$0xff] }
  0x15   :  { %114 = vmatpush.msra.mxu1 %v101_v7  ;;  %v136_v29 = vld [vmem:[#allocation4 + $0x28] sm:$0xff]  ;;  %v183_v30 = vld [vmem:[%s315_s2] ss:$0 sm:$0xff]  ;;  %v134_v35 = vld [vmem:[#allocation4 + $0x18] sm:$0xff] }
  0x16   :  { %153 = vmatpush.msra.mxu2 %v144_v21  ;;  %v135_v34 = vld [vmem:[#allocation4 + $0x20] sm:$0xff]  ;;  %v133_v36 = vld [vmem:[#allocation4 + $0x10] sm:$0xff]  ;;  %v132_v37 = vld [vmem:[#allocation4 + $0x8] sm:$0xff] }
  0x17   :  { %115 = vmatpush.msra.mxu1 %v100_v8  ;;  %v131_v38 = vld [vmem:[#allocation4] sm:$0xff] }
  0x18   :  { %154 = vmatpush.msra.mxu2 %v143_v22  ;;  %v184_v39 = vld [vmem:[%s317_s4] ss:$0 sm:$0xff] }
  0x19   :  { %116 = vmatpush.msra.mxu1 %v99_v9  ;;  %v185_v43 = vld [vmem:[%s319_s6] ss:$0 sm:$0xff] }
  0x1a   :  { %155 = vmatpush.msra.mxu2 %v142_v23 }
  0x1b   :  { %117 = vmatpush.msra.mxu1 %v98_v10 }
  0x1c   :  { %156 = vmatpush.msra.mxu2 %v141_v24 }
  0x1d   :  { %118 = vmatpush.msra.mxu1 %v97_v11 }
  0x1e   :  { %157 = vmatpush.msra.mxu2 %v140_v25 }
  0x1f   :  { %119 = vmatpush.msra.mxu1 %v96_v12 }
  0x20   :  { %158 = vmatpush.msra.mxu2 %v139_v26 }
  0x21   :  { %120 = vmatpush.msra.mxu1 %v95_v13 }
  0x22   :  { %159 = vmatpush.msra.mxu2 %v138_v27 }
  0x23   :  { %121 = vmatpush.msra.mxu1 %v94_v14 }
  0x24   :  { %160 = vmatpush.msra.mxu2 %v137_v28 }
  0x25   :  { %122 = vmatpush.msra.mxu1 %v93_v15 }
  0x26   :  { %161 = vmatpush.msra.mxu2 %v136_v29 }
  0x27   :  { %123 = vmatpush.msra.mxu1 %v92_v16 }
  0x28   :  { %162 = vmatpush.msra.mxu2 %v135_v34 }
  0x29   :  { %124 = vmatpush.msra.mxu1 %v91_v17 }
  0x2a   :  { %163 = vmatpush.msra.mxu2 %v134_v35 }
  0x2b   :  { %125 = vmatpush.msra.mxu1 %v90_v18 }
  0x2c   :  { %164 = vmatpush.msra.mxu2 %v133_v36 }
  0x2e   :  { %165 = vmatpush.msra.mxu2 %v132_v37 }
  0x30   :  { %166 = vmatpush.msra.mxu2 %v131_v38 }
  0x8c   :  { %v86_v31 = vpop.f32.mrf.mxu0 }
  0x8d   :  { %v87_v32 = vadd.f32 %v183_v30, %v86_v31 }
  0x8f   :  { %186 = vtanh.f32 %v87_v32 }
  0x95   :  { %v187_v33 = vpop.eup %186 }
  0x96   :  { %126 = vmatmul.f32.vlgmr.msra.gmra.mxu1 %v187_v33 }
 0x113   :  { %v127_v40 = vpop.f32.mrf.mxu1 }
 0x114   :  { %v128_v41 = vadd.f32 %v184_v39, %v127_v40 }
 0x116   :  { %188 = vtanh.f32 %v128_v41 }
 0x11c   :  { %v189_v42 = vpop.eup %188 }
 0x11d   :  { %167 = vmatmul.f32.vlgmr.msra.gmra.mxu2 %v189_v42 }
 0x1a0   :  { %v168_v44 = vpop.f32.mrf.mxu2 }
 0x1a1   :  { %v169_v45 = vadd.f32 %v185_v43, %v168_v44 }
 0x1a3   :  { %171 = vst [vmem:[%s320_s7] sm:$0xff] %v169_v45 }
 0x1a4   :  { %176 = vsyncpa [#allocation3], 1 }
 0x1a5   :  { %177 = vsyncpa [#allocation5], 1 }

</bundles_post_ra>
